<compile_context>
chip_gen: v5e
topology: v5e:2x2
jax: 0.10.0
libtpu: 0.0.40
codegen_flags: <defaults>
</compile_context>

<pallas_src>
import functools

import jax
import jax.numpy as jnp
from jax.experimental import pallas as pl
from jax.experimental.pallas import tpu as pltpu

_TM_CAP = 512
_TN_CAP = 512
_TK_CAP = 1024
_LANE = 128
_SUBLANE = 8


def _round_up(x: int, m: int) -> int:
    return ((x + m - 1) // m) * m


def _largest_divisor_tile(total: int, cap: int, align: int) -> int:
    """Largest multiple of `align` that divides `total` and is <= cap (total % align == 0)."""
    best = align
    t = align
    while t <= min(cap, total):
        if total % t == 0:
            best = t
        t += align
    return best


def _pick_tm(m: int):
    """Tile M: full-dim block when small (no pad); otherwise the multiple of 8 in [256, 512]
    minimizing padding (e.g. M=264 -> tm=264 full dim; M=520 -> tm=260? no: tm=8-aligned 264...)."""
    if m <= _TM_CAP:
        return m, m  # full-dim block, no padding, no trailing slice on M
    best_tm = _TM_CAP
    best_pad = _round_up(m, _TM_CAP) - m
    tm = 256
    while tm <= _TM_CAP:
        pad = _round_up(m, tm) - m
        if pad < best_pad:
            best_tm, best_pad = tm, pad
        tm += _SUBLANE
    return best_tm, _round_up(m, best_tm)


# -----------------------------------------------------------------------------
# One-time parameter preparation (model-load time; weight/bias are constants).
# -----------------------------------------------------------------------------
def prepare_linear_params(weight, bias):
    """Transpose the PyTorch-layout (Cout, Cin) weight to (Cin, Cout), pad to lane-dense tiles.

    Returns (w_prepped (Kp, Np), b_prepped (1, Np), plan dict with tile sizes).
    """
    cout, cin = weight.shape
    assert bias.shape == (cout,)

    np_ = _round_up(cout, _LANE)
    tn = _largest_divisor_tile(np_, _TN_CAP, _LANE)
    # Give v7x's two TensorCores at least 2 N tiles to shard when N allows it.
    if np_ // tn == 1 and np_ % (2 * _LANE) == 0:
        tn = np_ // 2

    if cin <= _TK_CAP:
        tk, kp = cin, cin                      # single K step, no K padding anywhere
    else:
        kp = _round_up(cin, _LANE)
        tk = _largest_divisor_tile(kp, _TK_CAP, _LANE)

    w_t = weight.T                              # one-time transpose of a constant
    w_p = jnp.pad(w_t, ((0, kp - cin), (0, np_ - cout)))
    b_p = jnp.pad(bias, (0, np_ - cout)).reshape(1, np_)
    plan = dict(cin=cin, cout=cout, kp=kp, np=np_, tk=tk, tn=tn)
    return w_p, b_p, plan


# -----------------------------------------------------------------------------
# Kernels
# -----------------------------------------------------------------------------
def _linear_kernel_single_k(x_ref, w_ref, b_ref, o_ref, *, compute_dtype):
    # x: (tm, Cin)  w: (Cin, tn)  b: (1, tn)  o: (tm, tn).  Single K step: no accumulation needed.
    o_ref[...] = (
        jnp.dot(x_ref[...].astype(compute_dtype),
                w_ref[...].astype(compute_dtype),
                preferred_element_type=jnp.float32)
        + b_ref[...]
    ).astype(o_ref.dtype)


def _linear_kernel_acc(x_ref, w_ref, b_ref, o_ref, *, compute_dtype):
    # x: (tm, tk)  w: (tk, tn)  b: (1, tn)  o: (tm, tn).
    # The output BlockSpec ignores k, so o_ref is resident in VMEM across the K axis and acts as
    # the f32 accumulator directly (no scratch, no finalize copy).
    k = pl.program_id(2)

    @pl.when(k == 0)
    def _():
        o_ref[...] = jnp.broadcast_to(b_ref[...], o_ref.shape).astype(o_ref.dtype)

    o_ref[...] += jnp.dot(
        x_ref[...].astype(compute_dtype),
        w_ref[...].astype(compute_dtype),
        preferred_element_type=jnp.float32,
    )


# -----------------------------------------------------------------------------
# Forward
# -----------------------------------------------------------------------------
def linear_forward(x, w_p, b_p, plan, *, compute_dtype=jnp.bfloat16):
    """y = x @ weight.T + bias, using parameters prepared by prepare_linear_params."""
    cin, cout = plan["cin"], plan["cout"]
    kp, np_, tk, tn = plan["kp"], plan["np"], plan["tk"], plan["tn"]

    lead = x.shape[:-1]
    assert x.shape[-1] == cin, "in_features mismatch"
    x2 = x.reshape(-1, cin)
    m = x2.shape[0]
    tm, mp = _pick_tm(m)

    # Activation padding only when forced (large M, or Cin > tk cap and unaligned).
    if mp != m or kp != cin:
        x2 = jnp.pad(x2, ((0, mp - m), (0, kp - cin)))

    k_steps = kp // tk
    cost = pl.CostEstimate(
        flops=2 * mp * np_ * kp,
        transcendentals=0,
        bytes_accessed=(mp * kp + kp * np_ + mp * np_) * 4,
    )
    cparams = pltpu.CompilerParams(
        dimension_semantics=(("parallel", "parallel", "arbitrary") if k_steps > 1
                             else ("parallel", "parallel")),
        vmem_limit_bytes=32 * 1024 * 1024,
    )
    out_shape = jax.ShapeDtypeStruct((mp, np_), x.dtype)

    if k_steps == 1:
        out = pl.pallas_call(
            functools.partial(_linear_kernel_single_k, compute_dtype=compute_dtype),
            out_shape=out_shape,
            grid_spec=pltpu.PrefetchScalarGridSpec(
                num_scalar_prefetch=0,
                grid=(mp // tm, np_ // tn),
                in_specs=[
                    pl.BlockSpec((tm, tk), lambda i, j: (i, 0)),   # x tile
                    pl.BlockSpec((tk, tn), lambda i, j: (0, j)),   # weight tile (Cin, Cout layout)
                    pl.BlockSpec((1, tn), lambda i, j: (0, j)),    # bias tile
                ],
                out_specs=pl.BlockSpec((tm, tn), lambda i, j: (i, j)),
            ),
            compiler_params=cparams,
            cost_estimate=cost,
        )(x2, w_p, b_p)
    else:
        out = pl.pallas_call(
            functools.partial(_linear_kernel_acc, compute_dtype=compute_dtype),
            out_shape=out_shape,
            grid_spec=pltpu.PrefetchScalarGridSpec(
                num_scalar_prefetch=0,
                grid=(mp // tm, np_ // tn, k_steps),
                in_specs=[
                    pl.BlockSpec((tm, tk), lambda i, j, k: (i, k)),
                    pl.BlockSpec((tk, tn), lambda i, j, k: (k, j)),
                    pl.BlockSpec((1, tn), lambda i, j, k: (0, j)),
                ],
                out_specs=pl.BlockSpec((tm, tn), lambda i, j, k: (i, j)),
            ),
            compiler_params=cparams,
            cost_estimate=cost,
        )(x2, w_p, b_p)

    if mp != m or np_ != cout:
        out = out[:m, :cout]
    return out.reshape(*lead, cout)


def sparse_quantized_model_forward(x, weight, bias, *, compute_dtype=jnp.bfloat16):
    """Convenience wrapper: prepare (model-load) + forward in one call."""
    w_p, b_p, plan = prepare_linear_params(weight, bias)
    return linear_forward(x, w_p, b_p, plan, compute_dtype=compute_dtype)


if __name__ == "__main__":
    # Small shapes matching SparseQuantizedModel(in_channels, out_channels).
    in_channels = 32
    out_channels = 16
    batch = 8

    key = jax.random.PRNGKey(0)
    kx, kw, kb = jax.random.split(key, 3)

    x = jax.random.normal(kx, (batch, in_channels), dtype=jnp.float32)
    bound = 1.0 / (in_channels ** 0.5)          # nn.Linear default init scale
    weight = jax.random.uniform(kw, (out_channels, in_channels),
                                minval=-bound, maxval=bound, dtype=jnp.float32)
    bias = jax.random.uniform(kb, (out_channels,),
                              minval=-bound, maxval=bound, dtype=jnp.float32)

    # "Model load" (one-time): transpose + pad the constant parameters.
    w_p, b_p, plan = prepare_linear_params(weight, bias)
    out = linear_forward(x, w_p, b_p, plan)
    out = jax.block_until_ready(out)

    # Cross-check against plain f32 JAX reference. bf16 MXU operands (f32 accumulate) ->
    # tolerance loosened vs the pure-f32 reference.
    ref = x @ weight.T + bias
    assert out.shape == (batch, out_channels)
    assert jnp.allclose(out, ref, atol=2e-2, rtol=2e-2), float(jnp.max(jnp.abs(out - ref)))

    print("KERNEL_OK")
</pallas_src>

<mosaic_0001>
module attributes {stable_mosaic.version = 11 : i64} {
  func.func @_linear_kernel_single_k(%arg0: i32, %arg1: i32, %arg2: memref<8x32xf32, #tpu.memory_space<vmem>>, %arg3: memref<32x128xf32, #tpu.memory_space<vmem>>, %arg4: memref<1x128xf32, #tpu.memory_space<vmem>>, %arg5: memref<8x128xf32, #tpu.memory_space<vmem>>) attributes {dimension_semantics = [#tpu.dimension_semantics<parallel>, #tpu.dimension_semantics<parallel>], iteration_bounds = array<i64: 1, 1>, scalar_prefetch = 0 : i64, scratch_operands = 0 : i64, tpu.core_type = #tpu.core_type<tc>, window_params = [{transform_indices = @transform_0, window_bounds = array<i64: 8, 32>}, {transform_indices = @transform_1, window_bounds = array<i64: 32, 128>}, {transform_indices = @transform_2, window_bounds = array<i64: 1, 128>}, {transform_indices = @transform_3, window_bounds = array<i64: 8, 128>}]} {
    %c0 = arith.constant 0 : index
    %c0_0 = arith.constant 0 : index
    %0 = vector.load %arg2[%c0, %c0_0] : memref<8x32xf32, #tpu.memory_space<vmem>>, vector<8x32xf32>
    %1 = arith.truncf %0 : vector<8x32xf32> to vector<8x32xbf16>
    %c0_1 = arith.constant 0 : index
    %c0_2 = arith.constant 0 : index
    %2 = vector.load %arg3[%c0_1, %c0_2] : memref<32x128xf32, #tpu.memory_space<vmem>>, vector<32x128xf32>
    %3 = arith.truncf %2 : vector<32x128xf32> to vector<32x128xbf16>
    %cst = arith.constant dense<0.000000e+00> : vector<8x128xf32>
    %4 = tpu.matmul %1, %3, %cst {dimension_numbers = #tpu.dot_dimension_numbers<[1], [0], [0], [1], [0, 0, 1, 1], [], []>} : vector<8x32xbf16>, vector<32x128xbf16>, vector<8x128xf32> -> vector<8x128xf32>
    %c0_3 = arith.constant 0 : index
    %c0_4 = arith.constant 0 : index
    %5 = vector.load %arg4[%c0_3, %c0_4] : memref<1x128xf32, #tpu.memory_space<vmem>>, vector<1x128xf32>
    %6 = vector.broadcast %5 : vector<1x128xf32> to vector<8x128xf32>
    %7 = arith.addf %4, %6 : vector<8x128xf32>
    %c0_5 = arith.constant 0 : index
    %c0_6 = arith.constant 0 : index
    %8 = vector.load %arg5[%c0_5, %c0_6] : memref<8x128xf32, #tpu.memory_space<vmem>>, vector<8x128xf32>
    tpu.vector_store %arg5[%c0_5, %c0_6], %7 {strides = array<i32>} : memref<8x128xf32, #tpu.memory_space<vmem>>, vector<8x128xf32>,
    return
  }
  func.func @transform_0(%arg0: i32, %arg1: i32) -> (i32, i32) {
    %c0_i32 = arith.constant 0 : i32
    %c0_i32_0 = arith.constant 0 : i32
    return %arg0, %c0_i32 : i32, i32
  }
  func.func @transform_1(%arg0: i32, %arg1: i32) -> (i32, i32) {
    %c0_i32 = arith.constant 0 : i32
    %c0_i32_0 = arith.constant 0 : i32
    return %c0_i32, %arg1 : i32, i32
  }
  func.func @transform_2(%arg0: i32, %arg1: i32) -> (i32, i32) {
    %c0_i32 = arith.constant 0 : i32
    %c0_i32_0 = arith.constant 0 : i32
    return %c0_i32, %arg1 : i32, i32
  }
  func.func @transform_3(%arg0: i32, %arg1: i32) -> (i32, i32) {
    %c0_i32 = arith.constant 0 : i32
    return %arg0, %arg1 : i32, i32
  }
}

</mosaic_0001>

<bundles_post_ra>
// kernel: tpu_custom_call.1
= control target key start
LH: loop header
LB: loop body
LE: loop exit
PB: predicated region body
PF: predicated region fallthrough
CT: control target
= control target key end

     0   :  { %8 = vsyncpa [#allocation3], 0  ;;  %s216_s0 = inlined_call_operand.hbm [shape: f32[8,32], index: 0, kind: input, shape index: {}]   ;;  %s217_s1 = inlined_call_operand.hbm [shape: f32[32,128], index: 1, kind: input, shape index: {}]   ;;  %s218_s2 = inlined_call_operand.vmem [shape: f32[1,128], index: 2, kind: input, shape index: {}]   ;;  %s219_s3 = inlined_call_operand.hbm [shape: f32[8,128], index: 3, kind: output, shape index: {}]  }
   0x1   :  { %9 = vsyncpa [#allocation6], 0 }
   0x2   :  { %10 = vsyncpa [#allocation4], 0  ;;  %s16_s14 = sshll.u32 %s216_s0, 4  ;;  %s179_s15 = smov [#allocation2]   ;;  %s17_s14 = int_to_ptr.hbm [resolvable:$true] %s16_s14 }
   0x3   :  { %s18_s16 = sshll.u32 %s179_s15, 4  ;;  %s26_s19 = sshll.u32 %s217_s1, 4  ;;  %s19_s16 = int_to_ptr.vmem [resolvable:$true] %s18_s16  ;;  %s27_s19 = int_to_ptr.hbm [resolvable:$true] %s26_s19 }
   0x4   :  { %21 = dma.hbm_to_vmem [thread:$0]  %s17_s14, 128, %s19_s16, [#allocation3]  }
   0x5   :  { %s180_s20 = smov [#allocation5]   ;;  %s181_s22 = smov 128  }
   0x6   :  { %s28_s21 = sshll.u32 %s180_s20, 4  ;;  %s182_s23 = smov 8   ;;  %s29_s21 = int_to_ptr.vmem [resolvable:$true] %s28_s21 }
   0x7   :  { %34 = dma.hbm_to_vmem [thread:$0]  %s27_s19, 512, %s29_s21, [#allocation6], %s181_s22, %s181_s22, %s182_s23  }
   0x8   :  { %173 = dma.done.wait [#allocation3], 128  }
   0x9   :  { %174 = vsyncadd [#allocation3], 4294967168 }
   0xa   :  { %175 = dma.done.wait [#allocation6], 512  }
   0xb   :  { %176 = vsyncadd [#allocation6], 4294966784  ;;  %v50_v0 = vld [vmem:[#allocation5 + $0x10] sm:$0xff]  ;;  %v51_v1 = vld [vmem:[#allocation5 + $0x18] sm:$0xff]  ;;  %vm58_vm0 = vcmask 261120   ;;  %s183_s24 = smov [#allocation7]  }
   0xc   :  { %v48_v2 = vld [vmem:[#allocation5] sm:$0xff]  ;;  %v53_v3 = vpack.c.bf16 %v51_v1, %v50_v0  ;;  %v49_v4 = vld [vmem:[#allocation5 + $0x8] sm:$0xff]  ;;  %v46_v6 = vld [vmem:[#allocation2] sm:$0xff]  ;;  %s81_s25 = sshll.u32 %s183_s24, 4  ;;  %s83_s28 = sshll.u32 %s219_s3, 4  ;;  %s82_s25 = int_to_ptr.vmem [resolvable:$true] %s81_s25  ;;  %s84_s28 = int_to_ptr.hbm [resolvable:$true] %s83_s28 }
   0xd   :  { %v52_v5 = vpack.c.bf16 %v49_v4, %v48_v2  ;;  %v47_v7 = vpack.c.bf16 %v46_v6, %v46_v6  ;;  %v100_v8 = vld [vmem:[%s218_s2] ss:$0 sm:$0xff] }
   0xe   :  { %68 = vmatpush.bf16.msra.mxu0 %v53_v3 }
  0x12   :  { %69 = vmatpush.bf16.msra.mxu0 %v52_v5 }
  0x15   :  { %94 = vmatmul.msk.bf16.vlgmr.msra.gmra.mxu0 %vm58_vm0, %v47_v7 }
  0x92   :  { %v71_v9 = vpop.f32.mrf.mxu0 }
  0x93   :  { %v72_v10 = vadd.f32 %v100_v8, %v71_v9 }
  0x95   :  { %75 = vst [vmem:[#allocation7] sm:$0xff] %v72_v10 }
  0x96   :  { %86 = dma.vmem_to_hbm [thread:$0]  %s82_s25, 128, %s84_s28, [#allocation4]  }
  0x9a   :  { %v73_v11 = vpop.f32.mrf.mxu0 }
  0x9b   :  { %177 = dma.done.wait [#allocation4], 128  }
  0x9c   :  { %178 = vsyncadd [#allocation4], 4294967168 }
  0x9d   :  { %91 = vsyncpa [#allocation3], 1 }
  0x9e   :  { %92 = vsyncpa [#allocation6], 1 }
  0x9f   :  { %93 = vsyncpa [#allocation4], 1 }

</bundles_post_ra>
